<compile_context>
chip_gen: v6e
topology: v6e:2x2x1
jax: 0.10.0
libtpu: 0.0.40
codegen_flags: <defaults>
</compile_context>

<pallas_src>
import jax
import jax.numpy as jnp
import numpy as np
from jax.experimental import pallas as pl
from jax.experimental.pallas import tpu as pltpu


# ----------------------------- helpers ------------------------------------ #

def _vmem_capacity_bytes() -> int:
    """Physical VMEM capacity of the current chip; conservative fallback."""
    try:
        info = pltpu.get_tpu_info()
        cap = int(getattr(info, "vmem_capacity_bytes", 0) or 0)
        if cap > 0:
            return cap
    except Exception:
        pass
    return 64 << 20   # v7x-sized fallback: never over-provisions any generation


def _round_up(x: int, m: int) -> int:
    return ((x + m - 1) // m) * m


def _choose_tiling(out_dim, *, seq, n_embd, mid_dim, w_itemsize, out_itemsize):
    """Pick (tile_n, nt, out_pad): largest lane-dense tile whose double-buffered
    streamed blocks (w2/b2/out tiles) + resident x/w1/b1/h fit the VMEM budget."""
    out_128 = _round_up(out_dim, 128)
    cap = _vmem_capacity_bytes()
    budget = max(cap - (24 << 20), 8 << 20)           # headroom for compiler scratch
    max_tile = 4096 if cap <= (64 << 20) else 8192    # v7x (64 MiB) vs v5e/v6e (128 MiB)
    resident = (2 * (seq * n_embd * w_itemsize        # x (double-buffered)
                     + n_embd * mid_dim * w_itemsize  # w1
                     + mid_dim * 4)                   # b1 (f32)
                + seq * mid_dim * w_itemsize          # h scratch
                + (1 << 20))                          # slack / (8,128) padding
    per_lane = 2 * (mid_dim * w_itemsize + 4 + seq * out_itemsize)
    tn_max = max((budget - resident) // per_lane, 128)
    tn_max = max((int(tn_max) // 128) * 128, 128)
    tn_max = min(tn_max, max_tile, out_128)
    nt = -(-out_128 // tn_max)                        # cdiv
    tile_n = _round_up(-(-out_128 // nt), 128)        # minimize last-tile padding
    out_pad = nt * tile_n
    return tile_n, nt, out_pad


# ----------------------------- Pallas kernel ------------------------------ #

def _prefix_mlp_kernel(x_ref, w1_ref, b1_ref, w2_ref, b2_ref, o_ref, h_ref):
    """One (mlp g, out-tile n) grid step of  out = tanh(x@w1 + b1) @ w2 + b2.

    Refs (leading "which MLP"/"which tile" dims squeezed away by the BlockSpecs):
      x_ref  : (S, E)    resident, already in the weight dtype
      w1_ref : (E, M)    resident along the out-tile axis
      b1_ref : (1, M)    f32
      w2_ref : (M, TN)   streamed contiguous tile of the big second-layer weight
      b2_ref : (1, TN)   f32
      o_ref  : (S, TN)   lane-dense output tile
      h_ref  : (S, M)    VMEM scratch holding tanh(x@w1 + b1), computed once per MLP
    """
    @pl.when(pl.program_id(1) == 0)
    def _():
        h = jnp.dot(x_ref[...], w1_ref[...], preferred_element_type=jnp.float32)
        h_ref[...] = jnp.tanh(h + b1_ref[...]).astype(h_ref.dtype)   # f32 epilogue (EUP)

    out = jnp.dot(h_ref[...], w2_ref[...], preferred_element_type=jnp.float32)
    o_ref[...] = (out + b2_ref[...]).astype(o_ref.dtype)


def prefix_mlps(x, w1s, b1s, w2t, b2t, *, out_dtype=jnp.float32):
    """Run both control_trans MLPs (decoder + encoder) in one fused pallas_call.

    x   : [S, E]            shared wte(arange(S)) input, pre-cast to the weight dtype
    w1s : [G, E, M]         b1s : [G, 1, M]   (f32)
    w2s : [G, nt, M, TN]    b2s : [G, nt, 1, TN]   (pre-tiled, lane padded)
    returns [G, S, nt*TN] in out_dtype (slice off padding in the caller).
    """
    G, E, M = w1s.shape
    S = x.shape[0]
    _, nt, _, TN = w2t.shape
    O_pad = nt * TN
    wbytes = jnp.dtype(w1s.dtype).itemsize
    obytes = jnp.dtype(out_dtype).itemsize

    # Explicit scoped-VMEM budget: double-buffered blocks + the h scratch.
    vmem_need = (2 * (S * E * wbytes + E * M * wbytes + M * 4
                      + M * TN * wbytes + TN * 4 + S * TN * obytes)
                 + S * M * wbytes)
    cap = _vmem_capacity_bytes()
    ceiling = max(cap - (16 << 20), vmem_need + (2 << 20))   # never cap below need
    vmem_limit = int(min(max(vmem_need + (4 << 20), 16 << 20), ceiling))

    cost = pl.CostEstimate(
        flops=int(G * (2 * S * E * M + 2 * S * M * O_pad)),
        transcendentals=int(G * S * M),
        bytes_accessed=int(x.nbytes + w1s.nbytes + b1s.nbytes + w2t.nbytes
                           + b2t.nbytes + G * S * O_pad * obytes),
    )

    return pl.pallas_call(
        _prefix_mlp_kernel,
        out_shape=jax.ShapeDtypeStruct((G, S, O_pad), out_dtype),
        grid=(G, nt),
        in_specs=[
            pl.BlockSpec((S, E), lambda g, n: (0, 0)),                      # x (resident)
            pl.BlockSpec((None, E, M), lambda g, n: (g, 0, 0)),             # w1[g]
            pl.BlockSpec((None, 1, M), lambda g, n: (g, 0, 0)),             # b1[g]
            pl.BlockSpec((None, None, M, TN), lambda g, n: (g, n, 0, 0)),   # w2[g] tile
            pl.BlockSpec((None, None, 1, TN), lambda g, n: (g, n, 0, 0)),   # b2[g] tile
        ],
        out_specs=pl.BlockSpec((None, S, TN), lambda g, n: (g, 0, n)),
        scratch_shapes=[pltpu.VMEM((S, M), w1s.dtype)],                     # h scratch
        compiler_params=pltpu.CompilerParams(
            dimension_semantics=("parallel", "arbitrary"),
            vmem_limit_bytes=vmem_limit,
        ),
        cost_estimate=cost,
    )(x, w1s, b1s, w2t, b2t)


# ----------------------------- Module wrapper ------------------------------ #

class XattnPrefixPallas:
    """JAX/Pallas re-implementation of petl_factory.XattnPrefix (eval semantics)."""

    def __init__(self, *, num_hidden_layers, num_heads, n_embd, mid_dim,
                 attn_bn, prefix_dropout=0.0, weight_dtype=jnp.bfloat16,
                 out_dtype=jnp.float32, key=None):
        assert n_embd % num_heads == 0
        self.match_n_layer = num_hidden_layers
        self.match_n_head = num_heads
        self.n_embd = n_embd
        self.match_n_embd = n_embd // num_heads
        self.mid_dim = mid_dim
        self.attn_bn = attn_bn
        self.prefix_dropout = prefix_dropout
        self.out_dtype = out_dtype
        # TODO(synk): training-time nn.Dropout(prefix_dropout) not implemented;
        # forward matches PyTorch eval() semantics (dropout == identity).

        out_dim = num_hidden_layers * 2 * n_embd
        self.out_dim = out_dim
        tile_n, nt, out_pad = _choose_tiling(
            out_dim, seq=attn_bn, n_embd=n_embd, mid_dim=mid_dim,
            w_itemsize=jnp.dtype(weight_dtype).itemsize,
            out_itemsize=jnp.dtype(out_dtype).itemsize)
        self.tile_n, self.nt, self.out_pad = tile_n, nt, out_pad

        if key is None:
            key = jax.random.PRNGKey(0)
        ks = jax.random.split(key, 9)
        # Embedding table [attn_bn, n_embd]; input_tokens = arange(attn_bn), so the
        # gather is the table itself.
        self.wte = jax.random.normal(ks[0], (attn_bn, n_embd), jnp.float32)
        s1 = 1.0 / np.sqrt(n_embd)
        s2 = 1.0 / np.sqrt(mid_dim)
        # control_trans (decoder) and enc_control_trans (encoder), stacked on a
        # leading axis of size 2 so both MLPs run in a single fused pallas_call.
        w1s = jnp.stack([s1 * jax.random.normal(ks[1], (n_embd, mid_dim)),
                         s1 * jax.random.normal(ks[5], (n_embd, mid_dim))])
        b1s = jnp.stack([0.02 * jax.random.normal(ks[2], (1, mid_dim)),
                         0.02 * jax.random.normal(ks[6], (1, mid_dim))])
        w2s = jnp.stack([s2 * jax.random.normal(ks[3], (mid_dim, out_dim)),
                         s2 * jax.random.normal(ks[7], (mid_dim, out_dim))])
        b2s = jnp.stack([0.02 * jax.random.normal(ks[4], (1, out_dim)),
                         0.02 * jax.random.normal(ks[8], (1, out_dim))])

        # Kernel-side parameter layout:
        #  * x / w1 in the (possibly bf16) compute dtype, biases stay f32 (f32 epilogue)
        #  * w2/b2 lane-padded to out_pad and pre-tiled to [G, nt, M/1, tile_n] so each
        #    streamed tile is one contiguous HBM region.
        self.x_in = self.wte.astype(weight_dtype)      # wte(arange(S)), pre-cast once
        self.w1s = w1s.astype(weight_dtype)
        self.b1s = b1s.astype(jnp.float32)
        pad = out_pad - out_dim
        w2p = jnp.pad(w2s, ((0, 0), (0, 0), (0, pad)))
        b2p = jnp.pad(b2s, ((0, 0), (0, 0), (0, pad)))
        self.w2t = jnp.transpose(w2p.reshape(2, mid_dim, nt, tile_n),
                                 (0, 2, 1, 3)).astype(weight_dtype)
        self.b2t = jnp.transpose(b2p.reshape(2, 1, nt, tile_n),
                                 (0, 2, 1, 3)).astype(jnp.float32)

    # ---- reference helper (emulates the kernel's dtype casts; test only) ---- #
    def reference_flat(self, g):
        x = self.x_in.astype(jnp.float32)
        w1 = self.w1s[g].astype(jnp.float32)
        h = jnp.tanh(jnp.dot(x, w1) + self.b1s[g])
        h = h.astype(self.w1s.dtype).astype(jnp.float32)      # emulate h scratch dtype
        w2 = jnp.transpose(self.w2t[g], (1, 0, 2)).reshape(self.mid_dim, self.out_pad)
        b2 = jnp.transpose(self.b2t[g], (1, 0, 2)).reshape(1, self.out_pad)
        out = jnp.dot(h, w2[:, :self.out_dim].astype(jnp.float32)) + b2[:, :self.out_dim]
        return out

    def _layer_kv(self, flat, bsz):
        """[S, L*2*n_embd] -> list of (prev_key, prev_value), each [bsz*H, S, Dh].

        The reshape/transpose is done ONCE on the un-broadcast MLP output; the batch
        broadcast (identical rows, exactly as in the PyTorch reference where every
        batch row of temp_control is the same embedding table) happens last.
        """
        L, H, Dh, S = self.match_n_layer, self.match_n_head, self.match_n_embd, self.attn_bn
        base = jnp.transpose(flat.reshape(S, L * 2, H, Dh), (1, 2, 0, 3))  # [L*2,H,S,Dh]

        # TODO(synk): the broadcast below materializes bsz identical copies per layer
        # (PyTorch output contract [bsz*H, S, Dh]); downstream attention kernels should
        # consume base[None] ([1,H,S,Dh]) directly and broadcast in-kernel instead.
        def expand(x):  # [H, S, Dh] -> [bsz*H, S, Dh]
            return jnp.broadcast_to(x[None], (bsz, H, S, Dh)).reshape(bsz * H, S, Dh)

        return [(expand(base[2 * i]), expand(base[2 * i + 1])) for i in range(L)]

    def forward(self, bsz, nsamples=1):
        old_bsz = bsz
        bsz = bsz * nsamples
        S = self.attn_bn

        # Both control_trans MLPs in one fused, tiled, pipelined Pallas call.
        flats = prefix_mlps(self.x_in, self.w1s, self.b1s, self.w2t, self.b2t,
                            out_dtype=self.out_dtype)
        flats = flats[:, :, :self.out_dim]             # drop lane padding (if any)
        dec_kv = self._layer_kv(flats[0], bsz)         # decoder-side prefixes
        enc_kv = self._layer_kv(flats[1], old_bsz)     # encoder-side prefixes

        # torch.zeros(bsz, seqlen) in the reference -> float32 zeros.
        dec_mask = jnp.zeros((bsz, S), jnp.float32)
        enc_mask = jnp.zeros((old_bsz, S), jnp.float32)

        result = []
        for i in range(self.match_n_layer):
            result.append({
                'encoder_decoder': {
                    'prev_key': dec_kv[i][0],
                    'prev_value': dec_kv[i][1],
                    'prev_key_padding_mask': dec_mask,
                },
                'encoder': {
                    'prev_key': enc_kv[i][0],
                    'prev_value': enc_kv[i][1],
                    'prev_key_padding_mask': enc_mask,
                },
            })
        return result


# --------------------------------- main ------------------------------------ #

if __name__ == "__main__":
    # Small config: num_hidden_layers=2, num_heads=4, hidden=32, mid_dim=16, attn_bn=8
    L, H, E, M, S = 2, 4, 32, 16, 8
    Dh = E // H

    module = XattnPrefixPallas(
        num_hidden_layers=L, num_heads=H, n_embd=E, mid_dim=M, attn_bn=S,
        prefix_dropout=0.0, weight_dtype=jnp.bfloat16, out_dtype=jnp.float32,
        key=jax.random.PRNGKey(0),
    )

    bsz, nsamples = 2, 1
    result = module.forward(bsz, nsamples=nsamples)
    jax.block_until_ready(jax.tree_util.tree_leaves(result))

    # Shape / dtype sanity checks.
    assert len(result) == L
    assert result[0]['encoder_decoder']['prev_key'].shape == (bsz * nsamples * H, S, Dh)
    assert result[0]['encoder']['prev_value'].shape == (bsz * H, S, Dh)
    assert result[0]['encoder_decoder']['prev_key_padding_mask'].shape == (bsz * nsamples, S)
    assert result[0]['encoder']['prev_key_padding_mask'].dtype == jnp.float32

    # Numerical check against a pure-JAX reference emulating the kernel's dtype casts
    # (bf16 weights / f32 accumulation), so the comparison is tight yet bf16-safe.
    for g, (side, b) in enumerate((('encoder_decoder', bsz * nsamples),
                                   ('encoder', bsz))):
        flat = module.reference_flat(g)
        base = jnp.transpose(flat.reshape(S, L * 2, H, Dh), (1, 2, 0, 3))
        for i in range(L):
            got_k = result[i][side]['prev_key'].reshape(b, H, S, Dh)[0]
            got_v = result[i][side]['prev_value'].reshape(b, H, S, Dh)[0]
            np.testing.assert_allclose(np.asarray(got_k, np.float32),
                                       np.asarray(base[2 * i], np.float32),
                                       rtol=2e-2, atol=2e-3)
            np.testing.assert_allclose(np.asarray(got_v, np.float32),
                                       np.asarray(base[2 * i + 1], np.float32),
                                       rtol=2e-2, atol=2e-3)

    print("KERNEL_OK")
</pallas_src>

<mosaic_0001>
module attributes {stable_mosaic.version = 11 : i64} {
  func.func @_prefix_mlp_kernel(%arg0: i32, %arg1: i32, %arg2: memref<8x32xbf16, #tpu.memory_space<vmem>>, %arg3: memref<1x32x16xbf16, #tpu.memory_space<vmem>>, %arg4: memref<1x1x16xf32, #tpu.memory_space<vmem>>, %arg5: memref<1x1x16x128xbf16, #tpu.memory_space<vmem>>, %arg6: memref<1x1x1x128xf32, #tpu.memory_space<vmem>>, %arg7: memref<1x8x128xf32, #tpu.memory_space<vmem>>, %arg8: memref<8x16xbf16, #tpu.memory_space<vmem>>) attributes {dimension_semantics = [#tpu.dimension_semantics<parallel>, #tpu.dimension_semantics<arbitrary>], iteration_bounds = array<i64: 2, 1>, scalar_prefetch = 0 : i64, scratch_operands = 1 : i64, tpu.core_type = #tpu.core_type<tc>, window_params = [{pipeline_mode = #tpu.pipeline_mode<synchronous>, transform_indices = @transform_0, window_bounds = array<i64: 8, 32>}, {transform_indices = @transform_1, window_bounds = array<i64: 1, 32, 16>}, {transform_indices = @transform_2, window_bounds = array<i64: 1, 1, 16>}, {transform_indices = @transform_3, window_bounds = array<i64: 1, 1, 16, 128>}, {transform_indices = @transform_4, window_bounds = array<i64: 1, 1, 1, 128>}, {transform_indices = @transform_5, window_bounds = array<i64: 1, 8, 128>}]} {
    %c0_i32 = arith.constant 0 : i32
    %0 = arith.cmpi eq, %arg1, %c0_i32 : i32
    %1 = arith.extui %0 : i1 to i32
    %c0_i32_0 = arith.constant 0 : i32
    %2 = arith.cmpi ne, %1, %c0_i32_0 : i32
    scf.if %2 {
      %c0_13 = arith.constant 0 : index
      %c0_14 = arith.constant 0 : index
      %14 = vector.load %arg2[%c0_13, %c0_14] : memref<8x32xbf16, #tpu.memory_space<vmem>>, vector<8x32xbf16>
      %c0_15 = arith.constant 0 : index
      %c0_16 = arith.constant 0 : index
      %c0_17 = arith.constant 0 : index
      %15 = vector.load %arg3[%c0_15, %c0_16, %c0_17] : memref<1x32x16xbf16, #tpu.memory_space<vmem>>, vector<1x32x16xbf16>
      %16 = vector.shape_cast %15 : vector<1x32x16xbf16> to vector<32x16xbf16>
      %cst_18 = arith.constant dense<0.000000e+00> : vector<8x16xf32>
      %17 = tpu.matmul %14, %16, %cst_18 {dimension_numbers = #tpu.dot_dimension_numbers<[1], [0], [0], [1], [0, 0, 1, 1], [], []>} : vector<8x32xbf16>, vector<32x16xbf16>, vector<8x16xf32> -> vector<8x16xf32>
      %c0_19 = arith.constant 0 : index
      %c0_20 = arith.constant 0 : index
      %c0_21 = arith.constant 0 : index
      %18 = vector.load %arg4[%c0_19, %c0_20, %c0_21] : memref<1x1x16xf32, #tpu.memory_space<vmem>>, vector<1x1x16xf32>
      %19 = vector.shape_cast %18 : vector<1x1x16xf32> to vector<1x16xf32>
      %20 = vector.broadcast %19 : vector<1x16xf32> to vector<8x16xf32>
      %21 = arith.addf %17, %20 : vector<8x16xf32>
      %22 = math.tanh %21 : vector<8x16xf32>
      %23 = arith.truncf %22 : vector<8x16xf32> to vector<8x16xbf16>
      %c0_22 = arith.constant 0 : index
      %c0_23 = arith.constant 0 : index
      %24 = vector.load %arg8[%c0_22, %c0_23] : memref<8x16xbf16, #tpu.memory_space<vmem>>, vector<8x16xbf16>
      tpu.vector_store %arg8[%c0_22, %c0_23], %23 {strides = array<i32>} : memref<8x16xbf16, #tpu.memory_space<vmem>>, vector<8x16xbf16>,
    } else {
    }
    %c0 = arith.constant 0 : index
    %c0_1 = arith.constant 0 : index
    %3 = vector.load %arg8[%c0, %c0_1] : memref<8x16xbf16, #tpu.memory_space<vmem>>, vector<8x16xbf16>
    %c0_2 = arith.constant 0 : index
    %c0_3 = arith.constant 0 : index
    %c0_4 = arith.constant 0 : index
    %c0_5 = arith.constant 0 : index
    %4 = vector.load %arg5[%c0_2, %c0_3, %c0_4, %c0_5] : memref<1x1x16x128xbf16, #tpu.memory_space<vmem>>, vector<1x1x16x128xbf16>
    %5 = vector.shape_cast %4 : vector<1x1x16x128xbf16> to vector<16x128xbf16>
    %cst = arith.constant dense<0.000000e+00> : vector<8x128xf32>
    %6 = tpu.matmul %3, %5, %cst {dimension_numbers = #tpu.dot_dimension_numbers<[1], [0], [0], [1], [0, 0, 1, 1], [], []>} : vector<8x16xbf16>, vector<16x128xbf16>, vector<8x128xf32> -> vector<8x128xf32>
    %c0_6 = arith.constant 0 : index
    %c0_7 = arith.constant 0 : index
    %c0_8 = arith.constant 0 : index
    %c0_9 = arith.constant 0 : index
    %7 = vector.load %arg6[%c0_6, %c0_7, %c0_8, %c0_9] : memref<1x1x1x128xf32, #tpu.memory_space<vmem>>, vector<1x1x1x128xf32>
    %8 = vector.shape_cast %7 : vector<1x1x1x128xf32> to vector<1x128xf32>
    %9 = vector.broadcast %8 : vector<1x128xf32> to vector<8x128xf32>
    %10 = arith.addf %6, %9 : vector<8x128xf32>
    %c0_10 = arith.constant 0 : index
    %c0_11 = arith.constant 0 : index
    %c0_12 = arith.constant 0 : index
    %11 = vector.load %arg7[%c0_10, %c0_11, %c0_12] : memref<1x8x128xf32, #tpu.memory_space<vmem>>, vector<1x8x128xf32>
    %12 = vector.shape_cast %11 : vector<1x8x128xf32> to vector<8x128xf32>
    %13 = vector.shape_cast %10 : vector<8x128xf32> to vector<1x8x128xf32>
    tpu.vector_store %arg7[%c0_10, %c0_11, %c0_12], %13 {strides = array<i32>} : memref<1x8x128xf32, #tpu.memory_space<vmem>>, vector<1x8x128xf32>,
    return
  }
  func.func @transform_0(%arg0: i32, %arg1: i32) -> (i32, i32) {
    %c0_i32 = arith.constant 0 : i32
    %c0_i32_0 = arith.constant 0 : i32
    %c0_i32_1 = arith.constant 0 : i32
    return %c0_i32, %c0_i32_0 : i32, i32
  }
  func.func @transform_1(%arg0: i32, %arg1: i32) -> (i32, i32, i32) {
    %c0_i32 = arith.constant 0 : i32
    %c0_i32_0 = arith.constant 0 : i32
    %c0_i32_1 = arith.constant 0 : i32
    return %arg0, %c0_i32, %c0_i32_0 : i32, i32, i32
  }
  func.func @transform_2(%arg0: i32, %arg1: i32) -> (i32, i32, i32) {
    %c0_i32 = arith.constant 0 : i32
    %c0_i32_0 = arith.constant 0 : i32
    %c0_i32_1 = arith.constant 0 : i32
    return %arg0, %c0_i32, %c0_i32_0 : i32, i32, i32
  }
  func.func @transform_3(%arg0: i32, %arg1: i32) -> (i32, i32, i32, i32) {
    %c0_i32 = arith.constant 0 : i32
    %c0_i32_0 = arith.constant 0 : i32
    %c0_i32_1 = arith.constant 0 : i32
    return %arg0, %arg1, %c0_i32, %c0_i32_0 : i32, i32, i32, i32
  }
  func.func @transform_4(%arg0: i32, %arg1: i32) -> (i32, i32, i32, i32) {
    %c0_i32 = arith.constant 0 : i32
    %c0_i32_0 = arith.constant 0 : i32
    %c0_i32_1 = arith.constant 0 : i32
    return %arg0, %arg1, %c0_i32, %c0_i32_0 : i32, i32, i32, i32
  }
  func.func @transform_5(%arg0: i32, %arg1: i32) -> (i32, i32, i32) {
    %c0_i32 = arith.constant 0 : i32
    %c0_i32_0 = arith.constant 0 : i32
    return %arg0, %c0_i32, %arg1 : i32, i32, i32
  }
}

</mosaic_0001>

<bundles_post_ra>
// kernel: tpu_custom_call.1
= control target key start
LH: loop header
LB: loop body
LE: loop exit
PB: predicated region body
PF: predicated region fallthrough
CT: control target
= control target key end

     0   :  { %10 = vsyncpa [#allocation4], 0  ;;  %s917_s0 = inlined_call_operand.vmem [shape: bf16[8,32], index: 0, kind: input, shape index: {}]   ;;  %s918_s1 = inlined_call_operand.vmem [shape: bf16[2,32,16], index: 1, kind: input, shape index: {}]   ;;  %s919_s2 = inlined_call_operand.vmem [shape: f32[2,1,16], index: 2, kind: input, shape index: {}]   ;;  %s920_s3 = inlined_call_operand.vmem [shape: bf16[2,1,16,128], index: 3, kind: input, shape index: {}]   ;;  %s921_s4 = inlined_call_operand.vmem [shape: f32[2,1,1,128], index: 4, kind: input, shape index: {}]   ;;  %s922_s5 = inlined_call_operand.hbm [shape: f32[2,8,128], index: 5, kind: output, shape index: {}]  }
   0x1   :  { %12 = vsyncpa [#allocation4 + $0x1], 0  ;;  %s788_s18 = smov 0   ;;  %s790_s19 = smov 0  }
   0x2   :  { %s792_s20 = smov 0   ;;  %s794_s21 = smov 0  }
   0x3   :  { %s796_s22 = smov 0   ;;  %s798_s23 = smov 0  }
   0x4 LB: > { %s573_s24 = sadd.s32 4294967295, %s753_s23   ;;  %s574_s25 = sadd.s32 4294967294, %s753_s23   ;;  %s753_s23 = sphi %s798_s23, %s18_s23   ;;  %s749_s22 = sphi %s796_s22, %s929_s22   ;;  %s745_s21 = sphi %s794_s21, %s928_s21   ;;  %s741_s20 = sphi %s792_s20, %s927_s20   ;;  %s737_s19 = sphi %s790_s19, %s926_s19   ;;  %s733_s18 = sphi %s788_s18, %s925_s18  }
   0x5   : > { %s30_s26 = sadd.s32 1, %s749_s22  ;;  %s168_s27 = sadd.s32 1, %s741_s20 }
   0x6   : > { %p32_p0 = scmp.ge.s32.totalorder %s30_s26, 2  ;;  %p178_p1 = scmp.ne.s32.totalorder %s741_s20, %s737_s19 }
   0x7   : > { %p179_p2 = scmp.eq.s32.totalorder %s573_s24, 1  ;;  %p184_p3 = scmp.ne.s32.totalorder %s737_s19, %s733_s18 }
   0x8   : > { %s931_s26 = smov (%p32_p0, %s30_s26), 0  ;;  %p185_p5 = scmp.eq.s32.totalorder %s574_s25, 1 }
   0x9   : > { %p828_p4 = por %p179_p2, %p178_p1  ;;  %s163_s29 = ssub.s32 %s749_s22, %s931_s26 }
   0xa   : > { %p577_p6 = scmp.ge.s32.totalorder %s753_s23, 1  ;;  %p166_p7 = scmp.eq.s32.totalorder %s163_s29, 0 }
   0xb   : > { %p835_p8 = por %p185_p5, %p184_p3  ;;  %p241_p9 = scmp.lt.s32.totalorder %s753_s23, 3 }
   0xc   : > { %s841_s6 = scalar_select %p166_p7, %s741_s20, %s168_s27  }
   0xd   : > { %p242_p10 = pnand %p577_p6, %p241_p9 }
   0xe   : > { %p287_p11 = scmp.lt.s32.totalorder (!%p242_p10), %s745_s21, 1  ;;  %s284_s29 = sand.u32 (!%p242_p10), 1, %s737_s19  }
   0xf   : > { %245 = sbr.rel (%p242_p10) target bundleno = 460 (0x1cc), region = 40  ;;  %s591_s12 = sshll.u32 (!%p242_p10), %s745_s21, 7 }
  0x14   : > { %v755_v0 = vmov 0.0   ;;  %vm756_vm0 = vmmov 0   ;;  %s845_s7 = scalar_select %p287_p11, %s745_s21, 1  ;;  %v315_v3 = vld [vmem:[%s917_s0] sm:$0xf]  ;;  %vm339_vm1 = vcmask 261120  }
  0x15   : > { %601 = vmatprep.subr.bf16.mxu0 %v755_v0  ;;  %605 = vmatprep.mubr.msk.bf16.mxu0 %vm756_vm0, %v755_v0  ;;  %vm385_vm2 = vcmask 125952   ;;  %vm403_vm3 = vcmask 130048   ;;  %s757_s21 = smov [#allocation3]  }
  0x16   : > { %609 = vmatprep.subr.bf16.mxu1 %v755_v0  ;;  %611 = vmatprep.mubr.msk.bf16.mxu1 %vm756_vm0, %v755_v0  ;;  %s594_s8 = sshll.u32 %s845_s7, 4  ;;  %s595_s14 = sshll.u32 %s845_s7, 3 }
  0x17   : > { %s291_s11 = scalar_lea.vmem %s918_s1, %s594_s8  ;;  %s303_s17 = scalar_lea.vmem %s920_s3, %s595_s14 }
  0x18   : > { %v672_v1 = vld [vmem:[%s291_s11 + $0x8] sm:$0xff]   ;;  %v673_v2 = vld [vmem:[%s291_s11] sm:$0xff]   ;;  %s294_s27 = scalar_lea.vmem %s919_s2, %s845_s7  ;;  %s578_s8 = sshll.u32 %s284_s29, 3 }
  0x19   : > { %602 = vmatpush3.bf16.msra.mxu0 %v672_v1  ;;  %v674_v4 = vld [vmem:[%s303_s17] sm:$0xff]   ;;  %s309_s11 = scalar_lea.vmem %s921_s4, %s845_s7  ;;  %s286_s13 = scalar_lea.vmem [#allocation3], %s578_s8 }
  0x1a   : > { %603 = vmatprep.subr.bf16.mxu0 %v755_v0  ;;  %610 = vmatpush3.bf16.msra.mxu1 %v674_v4  ;;  %v583_v5 = vld [vmem:[%s294_s27] ss:$0 sm:$0xff]  ;;  %s463_s14 = sshll.u32 %s286_s13, 4  ;;  %s871_s17 = scalar_lea.hbm %s922_s5, %s591_s12  ;;  %s873_s14 = int_to_ptr.vmem [resolvable:$true] %s463_s14 }
  0x1b   : > { %v587_v14 = vld [vmem:[%s309_s11] ss:$0 sm:$0xff]  ;;  %s449_s7 = scalar_lea.sflag [#allocation4], %s284_s29  ;;  %s677_s24 = scalar_lea.vmem %s873_s14, 128 }
  0x1c   : > { %p678_p12 = scmp.ne.s32.totalorder %s873_s14, %s677_s24  ;;  %s681_s25 = sshll.u32 %s757_s21, 4  ;;  %s682_s25 = int_to_ptr.vmem [resolvable:$false] %s681_s25 }
  0x1d   : > { %604 = vmatpush3.bf16.msra.mxu0 %v673_v2  ;;  %s683_s27 = scalar_lea.vmem %s682_s25, 256  ;;  %p684_p1 = scmp.lt.s32.totalorder %s873_s14, %s682_s25 }
  0x1e   : > { %p679_p13 = pnand %p678_p12, %p828_p4  ;;  %p685_p2 = scmp.lt.s32.totalorder %s683_s27, %s677_s24 }
  0x20   : > { %606 = vmatmul.mubr.msk.bf16.vlgmr.msra.gmra.mxu0 %vm339_vm1, %v315_v3  ;;  %p680_p0 = pneg %p679_p13  ;;  %p686_p3 = por %p685_p2, %p684_p1 }
  0x22   : > { %p687_p5 = pnand %p686_p3, %p680_p0 }
  0xe0   : > { %v377_v6 = vpop.f32.mrf.mxu0 }
  0xe1   : > { %v378_v7 = vadd.f32 %v583_v5, %v377_v6 }
  0xe2   : > { %v607_v8 = vpop.f32.mrf.mxu0 }
  0xe3   : > { %675 = vtanh.f32 %v378_v7 }
  0xe4   : > { %v380_v9 = vpop.f32.mrf.mxu0 }
  0xe6   : > { %v608_v10 = vpop.f32.mrf.mxu0 }
  0xf0   : > { %v676_v11 = vpop.eup %675 }
  0xf1   : > { %v384_v12 = vpack.c.bf16 %v676_v11, %v676_v11 }
  0xf3   : > { %386 = vst.msk [vmem:[#allocation2] sm:$0xf] %vm385_vm2, %v384_v12 }
  0xfa   : > { %v387_v13 = vld [vmem:[#allocation2] sm:$0xf] }
  0xfb   : > { %612 = vmatmul.mubr.msk.bf16.vlgmr.msra.gmra.mxu1 %vm403_vm3, %v387_v13 }
 0x1bb   : > { %v441_v15 = vpop.f32.mrf.mxu1 }
 0x1bc   : > { %v442_v16 = vadd.f32 %v587_v14, %v441_v15 }
 0x1bd   : > { %v613_v17 = vpop.f32.mrf.mxu1 }
 0x1be   : > { %447 = vst [vmem:[%s286_s13] sm:$0xff] %v442_v16 }
 0x1bf   : > { %v444_v18 = vpop.f32.mrf.mxu1 }
 0x1c0   : > { %690 = shalt.err (!%p687_p5)
}
 0x1c1   : > { %s691_s8 = scalar_lea.hbm %s871_s17, 128  ;;  %s695_s10 = scalar_lea.hbm %s922_s5, 256 }
 0x1c2   : > { %p692_p6 = scmp.ne.s32.totalorder %s871_s17, %s691_s8  ;;  %p696_p10 = scmp.lt.s32.totalorder %s871_s17, %s922_s5 }
 0x1c3   : > { %p697_p11 = scmp.lt.s32.totalorder %s695_s10, %s691_s8 }
 0x1c4   : > { %p693_p7 = pnand %p692_p6, %p828_p4 }
 0x1c5   : > { %p698_p12 = por %p697_p11, %p696_p10 }
 0x1c6   : > { %p694_p9 = pneg %p693_p7 }
 0x1c8   : > { %p699_p13 = pnand %p698_p12, %p694_p9 }
 0x1ca   : > { %702 = shalt.err (!%p699_p13)
}
 0x1cb   : > { %615 = dma.vmem_to_hbm [thread:$0]  (%p828_p4), %s873_s14, 128, %s871_s17, %s449_s7   ;;  %v614_v19 = vpop.f32.mrf.mxu1 }
 0x1cc PF: > { %p621_p0 = scmp.ge.s32.totalorder %s753_s23, 2  ;;  %s475_s13 = sand.u32 1, %s733_s18  }
 0x1cd   : > { %s476_s15 = scalar_lea.sflag [#allocation4], %s475_s13 }
 0x1ce   : > { %p618_p1 = pnand %p621_p0, %p835_p8 }
 0x1d0   : > { %p619_p2 = pneg %p618_p1 }
 0x1d2   : > { %728 = dma.done.wait (%p619_p2), %s476_s15, 128  }
 0x1d3   : > { %730 = vsyncadd (%p619_p2), %s476_s15, 4294967168  ;;  %s18_s23 = sadd.s32 1, %s753_s23   ;;  %s925_s18 = smov %s737_s19 }
 0x1d4   : > { %p15_p3 = scmp.ge.s32.totalorder %s18_s23, 4   ;;  %s926_s19 = smov %s741_s20 }
 0x1d5   : > { %s927_s20 = smov %s841_s6  ;;  %s928_s21 = smov %s749_s22 }
 0x1d6   : > { %s929_s22 = smov %s931_s26  ;;  %17 = sbr.rel (!%p15_p3) target bundleno = 4 (0x4), region = 88 }
 0x1db   :  { %481 = vsyncpa [#allocation4], 1 }
 0x1dc   :  { %483 = vsyncpa [#allocation4 + $0x1], 1 }

</bundles_post_ra>
